<compile_context>
chip_gen: v7x
topology: tpu7x:2x2x1
jax: 0.10.0
libtpu: 0.0.40
codegen_flags: <defaults>
</compile_context>

<pallas_src>
import functools

import jax
import jax.numpy as jnp
from jax import lax
from jax.experimental import pallas as pl
from jax.experimental.pallas import tpu as pltpu


def _self_attention_kernel(tanh_gamma_ref, x_ref, w_ref, b_ref, o_ref, *,
                           cq, block_b):
    """One grid step: `block_b` batch elements, full (C, W) slab each.

    tanh_gamma_ref : SMEM (1,)      precomputed tanh(gamma)
    x_ref          : VMEM (Bb, C, W)
    w_ref          : VMEM (Co, C)   fused [wq; wk; wv] in Conv1d (out, in) layout
    b_ref          : VMEM (Co, 1)   fused biases
    o_ref          : VMEM (Bb, C, W)
    """
    w = w_ref[...]                                    # (Co, C)  (maybe bf16)
    b = b_ref[...]                                    # (Co, 1)  f32
    tg = tanh_gamma_ref[0]                            # scalar f32

    for n in range(block_b):                          # static, small unroll
        x_n = x_ref[n]                                # (C, W) f32

        # Fused 1x1-conv projections: proj = W_fused @ x_n + b  -> (Co, W)
        proj = lax.dot_general(
            w, x_n.astype(w.dtype),
            dimension_numbers=(((1,), (0,)), ((), ())),
            preferred_element_type=jnp.float32) + b

        q = proj[:cq, :]                              # (Cq, W)
        k = proj[cq:2 * cq, :]                        # (Cq, W)
        v = proj[2 * cq:, :]                          # (C,  W)

        # energy[i, j] = sum_c q[c, i] * k[c, j]  (== bmm(q^T, k)), no .T materialized
        energy = lax.dot_general(
            q.astype(w.dtype), k.astype(w.dtype),
            dimension_numbers=(((0,), (0,)), ((), ())),
            preferred_element_type=jnp.float32)       # (W, W)

        # numerically stable softmax over last dim; normalize via EUP reciprocal
        energy = energy - jnp.max(energy, axis=-1, keepdims=True)
        p = jnp.exp(energy)
        denom = jnp.sum(p, axis=-1, keepdims=True)
        attn = p * pl.reciprocal(denom, approx=True)  # (W, W) f32

        # out[c, i] = sum_j v[c, j] * attn[i, j]  (== bmm(v, attn^T))
        out = lax.dot_general(
            v.astype(w.dtype), attn.astype(w.dtype),
            dimension_numbers=(((1,), (1,)), ((), ())),
            preferred_element_type=jnp.float32)       # (C, W)

        o_ref[n] = (tg * out + x_n).astype(o_ref.dtype)


def self_attention(x, params, *, block_b=None, matmul_dtype=jnp.float32):
    """x: (B, C, W) float32 in the PyTorch NCW layout; returns (B, C, W)."""
    B, C, W = x.shape
    cq = C // 8
    co = 2 * cq + C

    # Fuse the three projection weights/biases once (Conv1d (out, in) layout).
    w_fused = jnp.concatenate([params["wq"], params["wk"], params["wv"]],
                              axis=0).astype(matmul_dtype)          # (Co, C)
    b_fused = jnp.concatenate([params["bq"], params["bk"], params["bv"]],
                              axis=0).reshape(co, 1).astype(jnp.float32)

    # Hoist tanh(gamma) out of the kernel; pass as SMEM scalar.
    tanh_gamma = jnp.tanh(params["gamma"]).astype(jnp.float32)      # (1,)

    if block_b is None:
        # largest divisor of B that is <= 8: several batch elems per grid step
        block_b = max(d for d in range(1, min(B, 8) + 1) if B % d == 0)
    assert B % block_b == 0
    grid = (B // block_b,)

    kernel = functools.partial(_self_attention_kernel, cq=cq, block_b=block_b)

    grid_spec = pltpu.PrefetchScalarGridSpec(
        num_scalar_prefetch=0,
        grid=grid,
        in_specs=[
            pl.BlockSpec(memory_space=pltpu.MemorySpace.SMEM),      # tanh(gamma)
            pl.BlockSpec((block_b, C, W), lambda b: (b, 0, 0)),     # x (NCW)
            pl.BlockSpec((co, C), lambda b: (0, 0)),                # fused W
            pl.BlockSpec((co, 1), lambda b: (0, 0)),                # fused bias
        ],
        out_specs=pl.BlockSpec((block_b, C, W), lambda b: (b, 0, 0)),
    )

    # Blocks are tiny here; set vmem_limit_bytes explicitly once W/C/block_b
    # grow beyond toy sizes (default scoped VMEM is 16/32 MiB, not physical).
    return pl.pallas_call(
        kernel,
        out_shape=jax.ShapeDtypeStruct((B, C, W), x.dtype),
        grid_spec=grid_spec,
        compiler_params=pltpu.CompilerParams(dimension_semantics=("parallel",)),
    )(tanh_gamma, x, w_fused, b_fused)


def init_params(key, C):
    """Deterministic init mirroring nn.Conv1d defaults (uniform +/- 1/sqrt(fan_in)).

    Weights are stored in the PyTorch Conv1d layout (out_channels, in_channels)
    with the kernel_size=1 axis squeezed.
    """
    Cq = C // 8
    ks = jax.random.split(key, 6)
    bound = 1.0 / jnp.sqrt(jnp.float32(C))  # fan_in = C * kernel_size(=1)
    u = lambda k, shape: jax.random.uniform(k, shape, jnp.float32, -bound, bound)
    return {
        "wq": u(ks[0], (Cq, C)), "bq": u(ks[1], (Cq,)),
        "wk": u(ks[2], (Cq, C)), "bk": u(ks[3], (Cq,)),
        "wv": u(ks[4], (C, C)),  "bv": u(ks[5], (C,)),
        "gamma": jnp.zeros((1,), jnp.float32),  # nn.Parameter(torch.tensor(0.0))
    }


def self_attention_ref(x, params):
    """Pure-JAX reference reproducing the PyTorch forward exactly (NCW layout)."""
    gamma = params["gamma"][0]
    q = jnp.einsum("oc,bcw->bow", params["wq"], x) + params["bq"][None, :, None]
    k = jnp.einsum("oc,bcw->bow", params["wk"], x) + params["bk"][None, :, None]
    v = jnp.einsum("oc,bcw->bow", params["wv"], x) + params["bv"][None, :, None]
    energy = jnp.einsum("bci,bcj->bij", q, k)              # (B, W, W)
    attn = jax.nn.softmax(energy, axis=-1)
    out = jnp.einsum("bcj,bij->bci", v, attn)              # (B, C, W)
    return jnp.tanh(gamma) * out + x


if __name__ == "__main__":
    key = jax.random.PRNGKey(0)
    k_x, k_p = jax.random.split(key)

    B, C, W = 2, 32, 16                      # in_dim=32 -> query/key dim 4
    x = jax.random.normal(k_x, (B, C, W), jnp.float32)
    params = init_params(k_p, C)

    # Module-faithful run (gamma initialized to 0.0, as in __init__).
    out = jax.block_until_ready(self_attention(x, params))
    assert out.shape == (B, C, W) and out.dtype == jnp.float32

    # Validation with nonzero gamma so the attention path is exercised.
    params_chk = dict(params, gamma=jnp.array([0.3], jnp.float32))
    want = self_attention_ref(x, params_chk)

    got = jax.block_until_ready(self_attention(x, params_chk))
    assert jnp.allclose(got, want, atol=5e-3, rtol=5e-3)

    # bf16 MXU-input path (v6e/v7x optimization); softmax/residual stay f32.
    got_bf16 = jax.block_until_ready(
        self_attention(x, params_chk, matmul_dtype=jnp.bfloat16))
    assert got_bf16.shape == (B, C, W)
    assert jnp.allclose(got_bf16, want, atol=5e-2, rtol=5e-2)

    print("KERNEL_OK")
</pallas_src>

<mosaic_0001>
module attributes {stable_mosaic.version = 11 : i64} {
  func.func @_self_attention_kernel(%arg0: i32, %arg1: memref<1xf32, #tpu.memory_space<smem>>, %arg2: memref<2x32x16xf32, #tpu.memory_space<vmem>>, %arg3: memref<40x32xf32, #tpu.memory_space<vmem>>, %arg4: memref<40x1xf32, #tpu.memory_space<vmem>>, %arg5: memref<2x32x16xf32, #tpu.memory_space<vmem>>) attributes {dimension_semantics = [#tpu.dimension_semantics<parallel>], iteration_bounds = array<i64: 1>, scalar_prefetch = 0 : i64, scratch_operands = 0 : i64, tpu.core_type = #tpu.core_type<tc>, window_params = [{transform_indices = @transform_0, window_bounds = array<i64: 1>}, {transform_indices = @transform_1, window_bounds = array<i64: 2, 32, 16>}, {pipeline_mode = #tpu.pipeline_mode<synchronous>, transform_indices = @transform_2, window_bounds = array<i64: 40, 32>}, {pipeline_mode = #tpu.pipeline_mode<synchronous>, transform_indices = @transform_3, window_bounds = array<i64: 40, 1>}, {transform_indices = @transform_4, window_bounds = array<i64: 2, 32, 16>}]} {
    %c0 = arith.constant 0 : index
    %c0_0 = arith.constant 0 : index
    %0 = vector.load %arg3[%c0, %c0_0] : memref<40x32xf32, #tpu.memory_space<vmem>>, vector<40x32xf32>
    %c0_1 = arith.constant 0 : index
    %c0_2 = arith.constant 0 : index
    %1 = vector.load %arg4[%c0_1, %c0_2] : memref<40x1xf32, #tpu.memory_space<vmem>>, vector<40x1xf32>
    %c0_3 = arith.constant 0 : index
    %2 = memref.load %arg1[%c0_3] : memref<1xf32, #tpu.memory_space<smem>>
    %c0_4 = arith.constant 0 : index
    %c0_5 = arith.constant 0 : index
    %c0_6 = arith.constant 0 : index
    %3 = vector.load %arg2[%c0_4, %c0_5, %c0_6] : memref<2x32x16xf32, #tpu.memory_space<vmem>>, vector<1x32x16xf32>
    %4 = vector.shape_cast %3 : vector<1x32x16xf32> to vector<32x16xf32>
    %cst = arith.constant dense<0.000000e+00> : vector<40x16xf32>
    %5 = tpu.matmul %0, %4, %cst {dimension_numbers = #tpu.dot_dimension_numbers<[1], [0], [0], [1], [0, 0, 1, 1], [], []>} : vector<40x32xf32>, vector<32x16xf32>, vector<40x16xf32> -> vector<40x16xf32>
    %6 = vector.broadcast %1 : vector<40x1xf32> to vector<40x16xf32>
    %7 = arith.addf %5, %6 : vector<40x16xf32>
    %8 = vector.extract_strided_slice %7 {offsets = [0, 0], sizes = [4, 16], strides = [1, 1]} : vector<40x16xf32> to vector<4x16xf32>
    %9 = vector.extract_strided_slice %7 {offsets = [4, 0], sizes = [4, 16], strides = [1, 1]} : vector<40x16xf32> to vector<4x16xf32>
    %10 = vector.extract_strided_slice %7 {offsets = [8, 0], sizes = [32, 16], strides = [1, 1]} : vector<40x16xf32> to vector<32x16xf32>
    %cst_7 = arith.constant dense<0.000000e+00> : vector<16x16xf32>
    %11 = tpu.matmul %8, %9, %cst_7 {dimension_numbers = #tpu.dot_dimension_numbers<[0], [0], [1], [1], [0, 1, 1, 1], [], []>} : vector<4x16xf32>, vector<4x16xf32>, vector<16x16xf32> -> vector<16x16xf32>
    %cst_8 = arith.constant dense<0xFF800000> : vector<16xf32>
    %12 = vector.multi_reduction <maximumf>, %11, %cst_8 [1] : vector<16x16xf32> to vector<16xf32>
    %13 = vector.shape_cast %12 : vector<16xf32> to vector<16x1xf32>
    %14 = vector.broadcast %13 : vector<16x1xf32> to vector<16x16xf32>
    %15 = arith.subf %11, %14 : vector<16x16xf32>
    %16 = math.exp %15 : vector<16x16xf32>
    %cst_9 = arith.constant dense<0.000000e+00> : vector<16xf32>
    %17 = vector.multi_reduction <add>, %16, %cst_9 [1] : vector<16x16xf32> to vector<16xf32>
    %18 = vector.shape_cast %17 : vector<16xf32> to vector<16x1xf32>
    %19 = tpu.reciprocal %18 {approx = true} : vector<16x1xf32> -> vector<16x1xf32>
    %20 = vector.broadcast %19 : vector<16x1xf32> to vector<16x16xf32>
    %21 = arith.mulf %16, %20 : vector<16x16xf32>
    %cst_10 = arith.constant dense<0.000000e+00> : vector<32x16xf32>
    %22 = tpu.matmul %10, %21, %cst_10 {dimension_numbers = #tpu.dot_dimension_numbers<[1], [1], [0], [0], [0, 0, 1, 0], [], []>} : vector<32x16xf32>, vector<16x16xf32>, vector<32x16xf32> -> vector<32x16xf32>
    %23 = vector.broadcast %2 : f32 to vector<32x16xf32>
    %24 = arith.mulf %23, %22 : vector<32x16xf32>
    %25 = arith.addf %24, %4 : vector<32x16xf32>
    %c0_11 = arith.constant 0 : index
    %c0_12 = arith.constant 0 : index
    %c0_13 = arith.constant 0 : index
    %26 = vector.load %arg5[%c0_11, %c0_12, %c0_13] : memref<2x32x16xf32, #tpu.memory_space<vmem>>, vector<1x32x16xf32>
    %27 = vector.shape_cast %26 : vector<1x32x16xf32> to vector<32x16xf32>
    %28 = vector.shape_cast %25 : vector<32x16xf32> to vector<1x32x16xf32>
    tpu.vector_store %arg5[%c0_11, %c0_12, %c0_13], %28 {strides = array<i32>} : memref<2x32x16xf32, #tpu.memory_space<vmem>>, vector<1x32x16xf32>,
    %c1 = arith.constant 1 : index
    %c0_14 = arith.constant 0 : index
    %c0_15 = arith.constant 0 : index
    %29 = vector.load %arg2[%c1, %c0_14, %c0_15] : memref<2x32x16xf32, #tpu.memory_space<vmem>>, vector<1x32x16xf32>
    %30 = vector.shape_cast %29 : vector<1x32x16xf32> to vector<32x16xf32>
    %cst_16 = arith.constant dense<0.000000e+00> : vector<40x16xf32>
    %31 = tpu.matmul %0, %30, %cst_16 {dimension_numbers = #tpu.dot_dimension_numbers<[1], [0], [0], [1], [0, 0, 1, 1], [], []>} : vector<40x32xf32>, vector<32x16xf32>, vector<40x16xf32> -> vector<40x16xf32>
    %32 = vector.broadcast %1 : vector<40x1xf32> to vector<40x16xf32>
    %33 = arith.addf %31, %32 : vector<40x16xf32>
    %34 = vector.extract_strided_slice %33 {offsets = [0, 0], sizes = [4, 16], strides = [1, 1]} : vector<40x16xf32> to vector<4x16xf32>
    %35 = vector.extract_strided_slice %33 {offsets = [4, 0], sizes = [4, 16], strides = [1, 1]} : vector<40x16xf32> to vector<4x16xf32>
    %36 = vector.extract_strided_slice %33 {offsets = [8, 0], sizes = [32, 16], strides = [1, 1]} : vector<40x16xf32> to vector<32x16xf32>
    %cst_17 = arith.constant dense<0.000000e+00> : vector<16x16xf32>
    %37 = tpu.matmul %34, %35, %cst_17 {dimension_numbers = #tpu.dot_dimension_numbers<[0], [0], [1], [1], [0, 1, 1, 1], [], []>} : vector<4x16xf32>, vector<4x16xf32>, vector<16x16xf32> -> vector<16x16xf32>
    %cst_18 = arith.constant dense<0xFF800000> : vector<16xf32>
    %38 = vector.multi_reduction <maximumf>, %37, %cst_18 [1] : vector<16x16xf32> to vector<16xf32>
    %39 = vector.shape_cast %38 : vector<16xf32> to vector<16x1xf32>
    %40 = vector.broadcast %39 : vector<16x1xf32> to vector<16x16xf32>
    %41 = arith.subf %37, %40 : vector<16x16xf32>
    %42 = math.exp %41 : vector<16x16xf32>
    %cst_19 = arith.constant dense<0.000000e+00> : vector<16xf32>
    %43 = vector.multi_reduction <add>, %42, %cst_19 [1] : vector<16x16xf32> to vector<16xf32>
    %44 = vector.shape_cast %43 : vector<16xf32> to vector<16x1xf32>
    %45 = tpu.reciprocal %44 {approx = true} : vector<16x1xf32> -> vector<16x1xf32>
    %46 = vector.broadcast %45 : vector<16x1xf32> to vector<16x16xf32>
    %47 = arith.mulf %42, %46 : vector<16x16xf32>
    %cst_20 = arith.constant dense<0.000000e+00> : vector<32x16xf32>
    %48 = tpu.matmul %36, %47, %cst_20 {dimension_numbers = #tpu.dot_dimension_numbers<[1], [1], [0], [0], [0, 0, 1, 0], [], []>} : vector<32x16xf32>, vector<16x16xf32>, vector<32x16xf32> -> vector<32x16xf32>
    %49 = vector.broadcast %2 : f32 to vector<32x16xf32>
    %50 = arith.mulf %49, %48 : vector<32x16xf32>
    %51 = arith.addf %50, %30 : vector<32x16xf32>
    %c1_21 = arith.constant 1 : index
    %c0_22 = arith.constant 0 : index
    %c0_23 = arith.constant 0 : index
    %52 = vector.load %arg5[%c1_21, %c0_22, %c0_23] : memref<2x32x16xf32, #tpu.memory_space<vmem>>, vector<1x32x16xf32>
    %53 = vector.shape_cast %52 : vector<1x32x16xf32> to vector<32x16xf32>
    %54 = vector.shape_cast %51 : vector<32x16xf32> to vector<1x32x16xf32>
    tpu.vector_store %arg5[%c1_21, %c0_22, %c0_23], %54 {strides = array<i32>} : memref<2x32x16xf32, #tpu.memory_space<vmem>>, vector<1x32x16xf32>,
    return
  }
  func.func @transform_0(%arg0: i32) -> i32 {
    %c0_i32 = arith.constant 0 : i32
    %c0_i32_0 = arith.constant 0 : i32
    return %c0_i32 : i32
  }
  func.func @transform_1(%arg0: i32) -> (i32, i32, i32) {
    %c0_i32 = arith.constant 0 : i32
    %c0_i32_0 = arith.constant 0 : i32
    %c0_i32_1 = arith.constant 0 : i32
    return %arg0, %c0_i32, %c0_i32_0 : i32, i32, i32
  }
  func.func @transform_2(%arg0: i32) -> (i32, i32) {
    %c0_i32 = arith.constant 0 : i32
    %c0_i32_0 = arith.constant 0 : i32
    %c0_i32_1 = arith.constant 0 : i32
    return %c0_i32, %c0_i32_0 : i32, i32
  }
  func.func @transform_3(%arg0: i32) -> (i32, i32) {
    %c0_i32 = arith.constant 0 : i32
    %c0_i32_0 = arith.constant 0 : i32
    %c0_i32_1 = arith.constant 0 : i32
    return %c0_i32, %c0_i32_0 : i32, i32
  }
  func.func @transform_4(%arg0: i32) -> (i32, i32, i32) {
    %c0_i32 = arith.constant 0 : i32
    %c0_i32_0 = arith.constant 0 : i32
    %c0_i32_1 = arith.constant 0 : i32
    return %arg0, %c0_i32, %c0_i32_0 : i32, i32, i32
  }
}

</mosaic_0001>

<bundles_post_ra>
// kernel: tpu_custom_call.1
= control target key start
LH: loop header
LB: loop body
LE: loop exit
PB: predicated region body
PF: predicated region fallthrough
CT: control target
= control target key end

     0   :  { %v970_v0 = vmov 0.0|0.0   ;;  %vm971_vm0 = vmmov 0   ;;  %v972_v4 = vmov 0.0   ;;  %v973_v7 = vmov 0   ;;  %s1248_s1 = inlined_call_operand.vmem [shape: f32[2,32,16], index: 1, kind: input, shape index: {}]   ;;  %s1249_s3 = inlined_call_operand.vmem [shape: f32[40,1], index: 3, kind: input, shape index: {}]   ;;  %s1250_s2 = inlined_call_operand.vmem [shape: f32[40,32], index: 2, kind: input, shape index: {}]   ;;  %s1251_s0 = inlined_call_operand.<no memory space> [shape: f32[1], index: 0, kind: input, shape index: {}]   ;;  %s1252_s4 = inlined_call_operand.vmem [shape: f32[2,32,16], index: 4, kind: output, shape index: {}]  }
   0x1   :  { %924 = vmatprep.subr.bf16.mxu0 %v970_v0  ;;  %v1003_v1 = vld [vmem:[%s1248_s1] sm:$0xff]  ;;  %v1008_v2 = vld [vmem:[%s1248_s1 + $0x8] sm:$0xff]  ;;  %v1013_v3 = vld [vmem:[%s1248_s1 + $0x10] sm:$0xff]  ;;  %856 = vmatprep.mubr.msk.f32.mxu0 %vm971_vm0, %v972_v4  ;;  %vm58_vm1 = vcmask 261120   ;;  %vm205_vm2 = vcmask 1043456   ;;  %vm198_vm3 = vcmask 31744  }
   0x2   :  { %v925_v5 = vpack.c.bf16 %v1008_v2, %v1003_v1  ;;  %v1022_v6 = vld [vmem:[%s1248_s1 + $0x18] sm:$0xff]  ;;  %952 = vset.pattern.permute.xlu0 %v973_v7  ;;  %v23_v8 = vld [vmem:[%s1249_s3] sm:$0xff]  ;;  %953 = vset.pattern.permute.xlu1 %v973_v7  ;;  %v1042_v11 = vld [vmem:[%s1250_s2 + $0x8] sm:$0xff]  ;;  %vm283_vm4 = vcmask 130048  }
   0x3   :  { %35 = vperm.xlu0 %952, %v23_v8   ;;  %v928_v9 = vpack.c.bf16 %v1022_v6, %v1013_v3  ;;  %v1033_v10 = vld [vmem:[%s1250_s2] sm:$0xff]  ;;  %v1051_v12 = vld [vmem:[%s1250_s2 + $0x10] sm:$0xff]  ;;  %v1060_v13 = vld [vmem:[%s1250_s2 + $0x18] sm:$0xff] }
   0x4   :  { %926 = vmatpush3.bf16.msra.mxu0 %v925_v5  ;;  %v26_v23 = vld [vmem:[%s1249_s3 + $0x18] sm:$0xff]  ;;  %v1083_v28 = vld [vmem:[%s1250_s2 + $0x20] sm:$0xff]  ;;  %v24_v33 = vld [vmem:[%s1249_s3 + $0x8] sm:$0xff] }
   0x5   :  { %927 = vmatprep.subr.bf16.mxu0 %v970_v0  ;;  %v25_v34 = vld [vmem:[%s1249_s3 + $0x10] sm:$0xff]  ;;  %v27_v47 = vld [vmem:[%s1249_s3 + $0x20] sm:$0xff]  ;;  %vm1108_vm5 = vmpackc.low %vm283_vm4, %vm283_vm4 }
   0x6   :  { %v1120_v59 = vld [vmem:[%s1248_s1 + $0x20] sm:$0xff]  ;;  %v1125_v60 = vld [vmem:[%s1248_s1 + $0x28] sm:$0xff]  ;;  %v1136_v5 = vld [vmem:[%s1248_s1 + $0x30] sm:$0xff] }
   0x7   :  { %v937_v62 = vpack.c.bf16 %v1125_v60, %v1120_v59  ;;  %v1141_v7 = vld [vmem:[%s1248_s1 + $0x38] sm:$0xff] }
   0x8   :  { %929 = vmatpush3.bf16.msra.mxu0 %v928_v9 }
   0xb   :  { %857 = vmatmul.mubr.msk.f32.vlgmr.msra.gmra.mrb[0].mxu0 %vm58_vm1, %v1033_v10 }
   0xc   :  { %859 = vmatprep.mubr.msk.f32.mxu0 %vm971_vm0, %v972_v4 }
   0xf   :  { %860 = vmatmul.mubr.msk.f32.gmra.mrb[2].mxu0 %vm58_vm1, %v1042_v11 }
  0x10   :  { %862 = vmatprep.mubr.msk.f32.mxu0 %vm971_vm0, %v972_v4 }
  0x13   :  { %863 = vmatmul.mubr.msk.f32.gmra.mrb[4].mxu0 %vm58_vm1, %v1051_v12 }
  0x14   :  { %865 = vmatprep.mubr.msk.f32.mxu0 %vm971_vm0, %v972_v4 }
  0x17   :  { %866 = vmatmul.mubr.msk.f32.gmra.mrb[6].mxu0 %vm58_vm1, %v1060_v13 }
  0x18   :  { %868 = vmatprep.mubr.msk.f32.mxu0 %vm971_vm0, %v972_v4 }
  0x1b   :  { %869 = vmatmul.mubr.msk.f32.gmra.mrb[8].mxu0 %vm58_vm1, %v1083_v28 }
  0x82   :  { %v1066_v14 = vpop.permute.xlu0 %35 }
  0xde   :  { %v140_v15 = vpop.f32.mrb[0].mxu0 }
  0xdf   :  { %v141_v16 = vadd.f32 %v140_v15, %v1066_v14  ;;  %v858_v17 = vpop.f32.mrb[1].mxu0  ;;  %v940_v15 = vpack.c.bf16 %v1141_v7, %v1136_v5 }
  0xe1   :  { %164 = vxpose.xlu0.b32.start.end [1/1] (short) (narrow) %v141_v16, 16  ;;  %v197_v18 = vrot.slane %v141_v16, 4 }
  0xe2   :  { %v145_v19 = vpop.f32.mrb[2].mxu0 }
  0xe3   :  { %871 = vmatprep.subr.msk.mxu1 %vm205_vm2, %v197_v18  ;;  %v861_v20 = vpop.f32.mrb[3].mxu0 }
  0xe4   :  { %872 = vmatpush3.msk.msra.mxu1 %vm205_vm2, %v197_v18 }
  0xe6   :  { %v1071_v21 = vpop.f32.mrb[4].mxu0 }
  0xe7   :  { %v864_v22 = vpop.f32.mrb[5].mxu0 }
  0xea   :  { %v1076_v24 = vpop.f32.mrb[6].mxu0 }
  0xeb   :  { %v867_v25 = vpop.f32.mrb[7].mxu0 }
  0xee   :  { %v160_v48 = vpop.f32.mrb[8].mxu0 }
  0xef   :  { %v870_v49 = vpop.f32.mrb[9].mxu0 }
 0x10e   :  { %50 = vperm.xlu0 %952, %v26_v23  }
 0x161   :  { %v180_v26 = vpop.trf.xlu0 }
 0x162   :  { %873 = vmatprep.mubr.msk.f32.mxu1 %vm198_vm3, %v180_v26 }
 0x165   :  { %v181_v27 = vpop.trf.xlu0 }
 0x166   :  { %874 = vmatmul.mubr.msk.f32.vlgmr.msra.gmra.mrb[0].mxu1 %vm198_vm3, %v181_v27 }
 0x18d   :  { %v1127_v61 = vpop.permute.xlu0 %50 }
 0x18e   :  { %v156_v8 = vadd.f32 %v1076_v24, %v1127_v61 }
 0x239   :  { %v875_v29 = vpop.f32.mrb[0].mxu1 }
 0x23a   :  { %v274_v30 = vpop.f32.mrb[1].mxu1  ;;  %v287_v32 = vsel %vm283_vm4, %v875_v29, -inf }
 0x23b   :  { %v284_v31 = vsel %vm283_vm4, %v274_v30, -inf }
 0x23c   :  { %285 = vmax.xlane.f32.xlu1 %v284_v31 }
 0x240   :  { %288 = vmax.xlane.f32.xlu1 %v287_v32 }
 0x251   :  { %40 = vperm.xlu1 %953, %v24_v33  }
 0x255   :  { %45 = vperm.xlu1 %953, %v25_v34  }
 0x2c9   :  { %v286_v35 = vpop.xlane.xlu1 %285 }
 0x2ca   :  { %v290_v36 = vsub.f32 %v274_v30, %v286_v35 }
 0x2cc   :  { %v292_v39 = vmul.f32 1.442695, %v290_v36 }
 0x2cd   :  { %v289_v37 = vpop.xlane.xlu1 %288 }
 0x2ce   :  { %v291_v38 = vsub.f32 %v875_v29, %v289_v37 }
 0x2d0   :  { %v294_v40 = vmul.f32 1.442695, %v291_v38 }
 0x2d1   :  { %v1095_v41 = vpop.permute.xlu1 %40 }
 0x2d2   :  { %954 = vpow2.f32 %v294_v40  ;;  %v146_v42 = vadd.f32 %v145_v19, %v1095_v41 }
 0x2d3   :  { %956 = vpow2.f32 %v292_v39 }
 0x2d4   :  { %880 = vmatprep.mubr.msk.f32.mxu1 %vm283_vm4, %v146_v42 }
 0x2d5   :  { %v1104_v50 = vpop.permute.xlu1 %45 }
 0x2d6   :  { %v151_v63 = vadd.f32 %v1071_v21, %v1104_v50 }
 0x2dc   :  { %v955_v43 = vpop.eup %954 }
 0x2dd   :  { %v299_v44 = vsel %vm283_vm4, %v955_v43, 0.0  ;;  %v957_v45 = vpop.eup %956 }
 0x2de   :  { %300 = vadd.xlane.f32.xlu1 %v299_v44  ;;  %v296_v46 = vsel %vm283_vm4, %v957_v45, 0.0 }
 0x2e2   :  { %297 = vadd.xlane.f32.xlu1 %v296_v46 }
 0x2f3   :  { %55 = vperm.xlu1 %953, %v27_v47  }
 0x36b   :  { %v301_v51 = vpop.xlane.xlu1 %300 }
 0x36c   :  { %958 = vrcp.f32 %v301_v51 }
 0x36f   :  { %v298_v52 = vpop.xlane.xlu1 %297 }
 0x370   :  { %960 = vrcp.f32 %v298_v52 }
 0x373   :  { %v1145_v9 = vpop.permute.xlu1 %55 }
 0x374   :  { %v161_v16 = vadd.f32 %v160_v48, %v1145_v9 }
 0x376   :  { %v959_v53 = vpop.eup %958 }
 0x377   :  { %v305_v56 = vmul.f32 %v959_v53, %v955_v43 }
 0x37a   :  { %v961_v54 = vpop.eup %960 }
 0x37b   :  { %v304_v55 = vmul.f32 %v961_v54, %v957_v45 }
 0x37d   :  { %v930_v58 = vpack.c.bf16 %v305_v56, %v304_v55 }
 0x37f   :  { %932 = vmatprep.subr.msk.bf16.mxu1 %vm1108_vm5, %v930_v58 }
 0x380   :  { %935 = vmatpush3.bf16.xpose.msk.msra.mxu1 %vm1108_vm5, %v930_v58 }
 0x381   :  { %936 = vmatprep.subr.bf16.mxu1 %v970_v0 }
 0x387   :  { %881 = vmatmul.mubr.msk.f32.vlgmr.msra.gmra.mrb[2].mxu1 %vm283_vm4, %v151_v63 }
 0x388   :  { %883 = vmatprep.mubr.msk.f32.mxu1 %vm283_vm4, %v156_v8  ;;  %938 = vmatpush3.bf16.msra.mxu1 %v937_v62 }
 0x389   :  { %939 = vmatprep.subr.bf16.mxu1 %v970_v0  ;;  %v1177_v0 = vstv %s1251_s0 }
 0x38b   :  { %884 = vmatmul.mubr.msk.f32.gmra.mrb[4].mxu1 %vm283_vm4, %v161_v16 }
 0x38c   :  { %941 = vmatpush3.bf16.msra.mxu1 %v940_v15  ;;  %894 = vmatprep.mubr.msk.f32.mxu1 %vm971_vm0, %v972_v4 }
 0x38f   :  { %895 = vmatmul.mubr.msk.f32.vlgmr.msra.gmra.mrb[6].mxu1 %vm58_vm1, %v1033_v10 }
 0x390   :  { %897 = vmatprep.mubr.msk.f32.mxu1 %vm971_vm0, %v972_v4 }
 0x393   :  { %898 = vmatmul.mubr.msk.f32.gmra.mrb[8].mxu1 %vm58_vm1, %v1042_v11 }
 0x394   :  { %900 = vmatprep.mubr.msk.f32.mxu1 %vm971_vm0, %v972_v4 }
 0x397   :  { %901 = vmatmul.mubr.msk.f32.gmra.mrb[10].mxu1 %vm58_vm1, %v1051_v12 }
 0x398   :  { %903 = vmatprep.mubr.msk.f32.mxu1 %vm971_vm0, %v972_v4 }
 0x39b   :  { %904 = vmatmul.mubr.msk.f32.gmra.mrb[12].mxu1 %vm58_vm1, %v1060_v13 }
 0x39c   :  { %906 = vmatprep.mubr.msk.f32.mxu1 %vm971_vm0, %v972_v4 }
 0x39f   :  { %907 = vmatmul.mubr.msk.f32.gmra.mrb[14].mxu1 %vm58_vm1, %v1083_v28 }
 0x45a   :  { %v882_v10 = vpop.f32.mrb[2].mxu1 }
 0x45b   :  { %v411_v11 = vmul.f32 %v882_v10, %v1177_v0  ;;  %v390_v12 = vpop.f32.mrb[3].mxu1 }
 0x45c   :  { %v410_v17 = vmul.f32 %v1177_v0, %v390_v12 }
 0x45d   :  { %v415_v18 = vadd.f32 %v411_v11, %v1008_v2 }
 0x45e   :  { %v414_v13 = vadd.f32 %v410_v17, %v1003_v1  ;;  %v885_v19 = vpop.f32.mrb[4].mxu1 }
 0x45f   :  { %419 = vst.msk [vmem:[%s1252_s4 + $0x8] sm:$0xff] %vm283_vm4, %v415_v18  ;;  %v413_v4 = vmul.f32 %v885_v19, %v1177_v0  ;;  %v400_v20 = vpop.f32.mrb[5].mxu1 }
 0x460   :  { %418 = vst.msk [vmem:[%s1252_s4] sm:$0xff] %vm283_vm4, %v414_v13  ;;  %v412_v21 = vmul.f32 %v1177_v0, %v400_v20 }
 0x461   :  { %v417_v2 = vadd.f32 %v413_v4, %v1022_v6 }
 0x462   :  { %v416_v1 = vadd.f32 %v412_v21, %v1013_v3  ;;  %v493_v22 = vpop.f32.mrb[6].mxu1 }
 0x463   :  { %421 = vst.msk [vmem:[%s1252_s4 + $0x18] sm:$0xff] %vm283_vm4, %v417_v2  ;;  %v494_v23 = vadd.f32 %v493_v22, %v1066_v14  ;;  %v896_v24 = vpop.f32.mrb[7].mxu1 }
 0x464   :  { %420 = vst.msk [vmem:[%s1252_s4 + $0x10] sm:$0xff] %vm283_vm4, %v416_v1 }
 0x465   :  { %v550_v25 = vrot.slane %v494_v23, 4  ;;  %517 = vxpose.xlu1.b32.start.end [1/1] (short) (narrow) %v494_v23, 16 }
 0x466   :  { %v498_v26 = vpop.f32.mrb[8].mxu1 }
 0x467   :  { %v499_v6 = vadd.f32 %v498_v26, %v1095_v41  ;;  %909 = vmatprep.subr.msk.mxu1 %vm205_vm2, %v550_v25  ;;  %v899_v3 = vpop.f32.mrb[9].mxu1 }
 0x468   :  { %910 = vmatpush3.msk.msra.mxu1 %vm205_vm2, %v550_v25 }
 0x469   :  { %918 = vmatprep.mubr.msk.f32.mxu0 %vm283_vm4, %v499_v6 }
 0x46a   :  { %v503_v27 = vpop.f32.mrb[10].mxu1 }
 0x46b   :  { %v902_v14 = vpop.f32.mrb[11].mxu1  ;;  %v504_v56 = vadd.f32 %v503_v27, %v1104_v50 }
 0x46e   :  { %v508_v28 = vpop.f32.mrb[12].mxu1 }
 0x46f   :  { %v905_v29 = vpop.f32.mrb[13].mxu1  ;;  %v509_v58 = vadd.f32 %v508_v28, %v1127_v61 }
 0x472   :  { %v513_v30 = vpop.f32.mrb[14].mxu1 }
 0x473   :  { %v908_v31 = vpop.f32.mrb[15].mxu1  ;;  %v514_v62 = vadd.f32 %v513_v30, %v1145_v9 }
 0x4e5   :  { %v533_v32 = vpop.trf.xlu1 }
 0x4e6   :  { %911 = vmatprep.mubr.msk.f32.mxu1 %vm198_vm3, %v533_v32 }
 0x4e9   :  { %v534_v33 = vpop.trf.xlu1 }
 0x4ea   :  { %912 = vmatmul.mubr.msk.f32.vlgmr.msra.gmra.mrb[16].mxu1 %vm198_vm3, %v534_v33 }
 0x5bd   :  { %v913_v34 = vpop.f32.mrb[16].mxu1 }
 0x5be   :  { %v625_v35 = vpop.f32.mrb[17].mxu1  ;;  %v637_v36 = vsel %vm283_vm4, %v913_v34, -inf }
 0x5bf   :  { %638 = vmax.xlane.f32.xlu1 %v637_v36  ;;  %v634_v37 = vsel %vm283_vm4, %v625_v35, -inf }
 0x5c0   :  { %635 = vmax.xlane.f32.xlu0 %v634_v37 }
 0x64c   :  { %v639_v38 = vpop.xlane.xlu1 %638 }
 0x64d   :  { %v641_v39 = vsub.f32 %v913_v34, %v639_v38  ;;  %v636_v40 = vpop.xlane.xlu0 %635 }
 0x64e   :  { %v640_v41 = vsub.f32 %v625_v35, %v636_v40 }
 0x64f   :  { %v644_v42 = vmul.f32 1.442695, %v641_v39 }
 0x650   :  { %v642_v43 = vmul.f32 1.442695, %v640_v41 }
 0x652   :  { %962 = vpow2.f32 %v642_v43 }
 0x653   :  { %964 = vpow2.f32 %v644_v42 }
 0x65c   :  { %v963_v44 = vpop.eup %962 }
 0x65d   :  { %v646_v45 = vsel %vm283_vm4, %v963_v44, 0.0  ;;  %v965_v46 = vpop.eup %964 }
 0x65e   :  { %647 = vadd.xlane.f32.xlu0 %v646_v45  ;;  %v649_v47 = vsel %vm283_vm4, %v965_v46, 0.0 }
 0x662   :  { %650 = vadd.xlane.f32.xlu0 %v649_v47 }
 0x6eb   :  { %v648_v48 = vpop.xlane.xlu0 %647 }
 0x6ec   :  { %966 = vrcp.f32 %v648_v48 }
 0x6ef   :  { %v651_v49 = vpop.xlane.xlu0 %650 }
 0x6f0   :  { %968 = vrcp.f32 %v651_v49 }
 0x6f6   :  { %v967_v51 = vpop.eup %966 }
 0x6f7   :  { %v654_v53 = vmul.f32 %v967_v51, %v963_v44 }
 0x6fa   :  { %v969_v52 = vpop.eup %968 }
 0x6fb   :  { %v655_v54 = vmul.f32 %v969_v52, %v965_v46 }
 0x6fd   :  { %v942_v55 = vpack.c.bf16 %v655_v54, %v654_v53 }
 0x6ff   :  { %944 = vmatprep.subr.msk.bf16.mxu0 %vm1108_vm5, %v942_v55 }
 0x700   :  { %947 = vmatpush3.bf16.xpose.msk.msra.mxu0 %vm1108_vm5, %v942_v55 }
 0x707   :  { %919 = vmatmul.mubr.msk.f32.vlgmr.msra.gmra.mrb[10].mxu0 %vm283_vm4, %v504_v56 }
 0x708   :  { %921 = vmatprep.mubr.msk.f32.mxu0 %vm283_vm4, %v509_v58 }
 0x70b   :  { %922 = vmatmul.mubr.msk.f32.gmra.mrb[12].mxu0 %vm283_vm4, %v514_v62 }
 0x7da   :  { %v920_v63 = vpop.f32.mrb[10].mxu0 }
 0x7db   :  { %v760_v8 = vmul.f32 %v920_v63, %v1177_v0  ;;  %v740_v15 = vpop.f32.mrb[11].mxu0 }
 0x7dc   :  { %v759_v16 = vmul.f32 %v740_v15, %v1177_v0 }
 0x7dd   :  { %v764_v57 = vadd.f32 %v1125_v60, %v760_v8 }
 0x7de   :  { %v763_v50 = vadd.f32 %v1120_v59, %v759_v16  ;;  %v923_v10 = vpop.f32.mrb[12].mxu0 }
 0x7df   :  { %809 = vst.msk [vmem:[%s1252_s4 + $0x28] sm:$0xff] %vm283_vm4, %v764_v57  ;;  %v762_v61 = vmul.f32 %v923_v10, %v1177_v0  ;;  %v750_v9 = vpop.f32.mrb[13].mxu0 }
 0x7e0   :  { %808 = vst.msk [vmem:[%s1252_s4 + $0x20] sm:$0xff] %vm283_vm4, %v763_v50  ;;  %v761_v11 = vmul.f32 %v750_v9, %v1177_v0 }
 0x7e1   :  { %v766_v60 = vadd.f32 %v1141_v7, %v762_v61 }
 0x7e2   :  { %v765_v59 = vadd.f32 %v1136_v5, %v761_v11 }
 0x7e3   :  { %811 = vst.msk [vmem:[%s1252_s4 + $0x38] sm:$0xff] %vm283_vm4, %v766_v60 }
 0x7e4   :  { %810 = vst.msk [vmem:[%s1252_s4 + $0x30] sm:$0xff] %vm283_vm4, %v765_v59 }

</bundles_post_ra>
